<compile_context>
chip_gen: v7x
topology: tpu7x:2x2x1
jax: 0.10.0
libtpu: 0.0.40
codegen_flags: <defaults>
</compile_context>

<pallas_src>
import functools
import math

import jax
import jax.numpy as jnp
from jax import lax
from jax.experimental import pallas as pl
from jax.experimental.pallas import tpu as pltpu

_MIB = 1024 * 1024
# Conservative scoped-VMEM budget that is safe on every generation
# (v7x: 64 MiB physical per TensorCore; v5e/v6e: 128 MiB).
_VMEM_BUDGET = 48 * _MIB


def _round_up(x, m):
    return (x + m - 1) // m * m


def _pick_tile(total, cap, candidates=(2048, 1024, 512, 256, 128)):
    """Largest candidate <= cap that divides `total` (total is a mult. of 128)."""
    for c in candidates:
        if c <= cap and total % c == 0:
            return c
    return 128


# ---------------------------------------------------------------------------
# Kernel A: DenseFullyConnected   h = x @ W + b
#   grid = (row tiles, ne reduction tiles); f32 accumulator; bias at finalize.
# ---------------------------------------------------------------------------
def dense_fc_kernel(x_ref, w_ref, b_ref, h_ref, acc_ref):
    k = pl.program_id(1)

    @pl.when(k == 0)
    def _init():
        acc_ref[...] = jnp.zeros_like(acc_ref)

    acc_ref[...] += jnp.dot(x_ref[...], w_ref[...],
                            preferred_element_type=jnp.float32)

    @pl.when(k == pl.num_programs(1) - 1)
    def _finalize():
        h_ref[...] = (acc_ref[...] + b_ref[...]).astype(h_ref.dtype)


def _fc_call(x_p, w_p, b_p, *, tm, tk, out_dtype, vmem_limit):
    nu_pad, ne_pad = x_p.shape
    l_pad = w_p.shape[1]
    return pl.pallas_call(
        dense_fc_kernel,
        out_shape=jax.ShapeDtypeStruct((nu_pad, l_pad), out_dtype),
        grid=(nu_pad // tm, ne_pad // tk),
        in_specs=[
            pl.BlockSpec((tm, tk), lambda i, k: (i, k)),
            pl.BlockSpec((tk, l_pad), lambda i, k: (k, 0)),
            pl.BlockSpec((1, l_pad), lambda i, k: (0, 0)),
        ],
        out_specs=pl.BlockSpec((tm, l_pad), lambda i, k: (i, 0)),
        scratch_shapes=[pltpu.VMEM((tm, l_pad), jnp.float32)],
        compiler_params=pltpu.CompilerParams(
            dimension_semantics=("parallel", "arbitrary"),
            vmem_limit_bytes=vmem_limit,
        ),
    )(x_p, w_p, b_p)


def dense_fully_connected(x, weight, bias):
    """Exact forward of the PyTorch module: x @ W + b  (f32 result, unpadded)."""
    nu, ne = x.shape
    L = weight.shape[1]
    nu_pad = _round_up(nu, 128)
    ne_pad = _round_up(ne, 128)
    l_pad = _round_up(L, 128)
    tm = _pick_tile(nu_pad, min(512, nu_pad), candidates=(512, 256, 128))
    tk = _pick_tile(ne_pad, 2048)

    x_p = jnp.zeros((nu_pad, ne_pad), jnp.bfloat16).at[:nu, :ne].set(
        x.astype(jnp.bfloat16))
    w_p = jnp.zeros((ne_pad, l_pad), jnp.bfloat16).at[:ne, :L].set(
        weight.astype(jnp.bfloat16))
    b_p = jnp.zeros((1, l_pad), jnp.float32).at[0, :L].set(
        bias.astype(jnp.float32))

    est = (2 * tm * tk * 2 + 2 * tk * l_pad * 2 + 2 * l_pad * 4
           + 2 * tm * l_pad * 4 + tm * l_pad * 4)
    vmem_limit = int(min(max(2 * est, 32 * _MIB), 48 * _MIB))
    h = _fc_call(x_p, w_p, b_p, tm=tm, tk=tk,
                 out_dtype=jnp.float32, vmem_limit=vmem_limit)
    return h[:nu, :L]


# ---------------------------------------------------------------------------
# Kernel B: out = log_softmax(adj @ h)
#   grid = (row tiles, adj-column reduction tiles); reduction axis LAST.
#   h is VMEM-resident (constant block) when it fits; out tile is the
#   accumulator (constant block index across k) -> no extra scratch.
# ---------------------------------------------------------------------------
def propagate_kernel(adj_ref, h_ref, out_ref, *, num_valid, tk, h_resident):
    k = pl.program_id(1)

    @pl.when(k == 0)
    def _init():
        out_ref[...] = jnp.zeros_like(out_ref)

    if h_resident:
        off = pl.multiple_of(k * tk, 128)
        h_blk = h_ref[pl.ds(off, tk), :]
    else:
        h_blk = h_ref[...]

    out_ref[...] += jnp.dot(adj_ref[...], h_blk,
                            preferred_element_type=jnp.float32)

    @pl.when(k == pl.num_programs(1) - 1)
    def _log_softmax():
        y = out_ref[...]
        # Mask padded label lanes so they do not corrupt the logsumexp.
        col = lax.broadcasted_iota(jnp.int32, y.shape, 1)
        y = jnp.where(col < num_valid, y, jnp.float32(-1e30))
        m = jnp.max(y, axis=1, keepdims=True)
        s = y - m
        lse = jnp.log(jnp.sum(jnp.exp(s), axis=1, keepdims=True))
        out_ref[...] = s - lse


# ---------------------------------------------------------------------------
# Init-time builder: pads/casts the fixed parameters (W, b, adj^K) ONCE and
# returns a jitted forward(x) -> log-probs.
# ---------------------------------------------------------------------------
def build_appnp_forward(weight, bias, adj):
    ne, L = weight.shape
    nu = adj.shape[0]

    nu_pad = _round_up(nu, 128)
    ne_pad = _round_up(ne, 128)
    l_pad = _round_up(L, 128)

    # Row tile: <= 512 and, when possible, at least two row tiles so both
    # v7x TensorCores get work on the "parallel" axis.
    tm_cap = nu_pad if nu_pad < 256 else min(512, max(128, nu_pad // 2))
    tm = _pick_tile(nu_pad, tm_cap, candidates=(512, 256, 128))

    # adj-column reduction tile: large (long contiguous DMA rows, few grid
    # steps), capped so the double-buffered adj tile stays within budget.
    tk_cap = min(2048, max(128, (_VMEM_BUDGET // 4) // (2 * tm * 2)))
    tk = _pick_tile(nu_pad, tk_cap)

    # Feature-reduction tile for the FC kernel.
    tkf_cap = min(2048, max(128, (_VMEM_BUDGET // 4) // (2 * tm * 2)))
    tkf = _pick_tile(ne_pad, tkf_cap)

    # Keep h fully resident in VMEM if (double-buffered) it fits the budget.
    # (pipeline_mode=pl.Buffered(1) could drop the second buffer; kept default
    #  here for maximum compatibility.)
    h_res_bytes = 2 * nu_pad * l_pad * 2
    h_resident = h_res_bytes <= _VMEM_BUDGET // 2

    h_in_bytes = h_res_bytes if h_resident else 2 * tk * l_pad * 2
    est_b = 2 * tm * tk * 2 + h_in_bytes + 2 * tm * l_pad * 4
    est_a = (2 * tm * tkf * 2 + 2 * tkf * l_pad * 2 + 2 * l_pad * 4
             + 2 * tm * l_pad * 2 + tm * l_pad * 4)
    vmem_limit = int(min(max(2 * max(est_a, est_b), 32 * _MIB), 48 * _MIB))

    # Padded bf16 parameters, computed once (adj^K / W / b are fixed).
    # TODO(synk): optional fp8 (v7x) / int8 (v5e/v6e) adj with per-row scales
    # would halve adj HBM traffic again; needs accuracy validation.
    w_p = jnp.zeros((ne_pad, l_pad), jnp.bfloat16).at[:ne, :L].set(
        jnp.asarray(weight, jnp.bfloat16))
    b_p = jnp.zeros((1, l_pad), jnp.float32).at[0, :L].set(
        jnp.asarray(bias, jnp.float32))
    adj_p = jnp.zeros((nu_pad, nu_pad), jnp.bfloat16).at[:nu, :nu].set(
        jnp.asarray(adj, jnp.bfloat16))

    if h_resident:
        h_spec = pl.BlockSpec((nu_pad, l_pad), lambda i, k: (0, 0))
    else:
        h_spec = pl.BlockSpec((tk, l_pad), lambda i, k: (k, 0))

    prop_kernel = functools.partial(
        propagate_kernel, num_valid=L, tk=tk, h_resident=h_resident)

    @jax.jit
    def forward(x):
        x_p = jnp.zeros((nu_pad, ne_pad), jnp.bfloat16).at[:nu, :ne].set(
            x.astype(jnp.bfloat16))

        # Kernel A: h = x @ W + b  (computed once, lane-dense bf16 output)
        h = _fc_call(x_p, w_p, b_p, tm=tm, tk=tkf,
                     out_dtype=jnp.bfloat16, vmem_limit=vmem_limit)

        # Kernel B: out = log_softmax(adj @ h)
        out = pl.pallas_call(
            prop_kernel,
            out_shape=jax.ShapeDtypeStruct((nu_pad, l_pad), jnp.float32),
            grid=(nu_pad // tm, nu_pad // tk),
            in_specs=[
                pl.BlockSpec((tm, tk), lambda i, k: (i, k)),
                h_spec,
            ],
            out_specs=pl.BlockSpec((tm, l_pad), lambda i, k: (i, 0)),
            compiler_params=pltpu.CompilerParams(
                dimension_semantics=("parallel", "arbitrary"),
                vmem_limit_bytes=vmem_limit,
            ),
        )(adj_p, h)
        return out[:nu, :L]

    return forward


# ---------------------------------------------------------------------------
# Pure-JAX reference with the same bf16-input / f32-accumulate dtype policy
# ---------------------------------------------------------------------------
def reference_fc(x, weight, bias):
    return jnp.dot(x.astype(jnp.bfloat16), weight.astype(jnp.bfloat16),
                   preferred_element_type=jnp.float32) + bias


def reference_forward(x, weight, bias, adj):
    h = reference_fc(x, weight, bias)
    hb = h.astype(jnp.bfloat16)
    y = jnp.dot(adj.astype(jnp.bfloat16), hb, preferred_element_type=jnp.float32)
    return jax.nn.log_softmax(y, axis=1)


if __name__ == "__main__":
    key = jax.random.PRNGKey(0)

    # Small synthetic problem (args.nu, args.ne, number_of_labels, args.K).
    nu, ne, L, K = 300, 260, 10, 2
    nnz = 2000

    k_r, k_c, k_v, k_w, k_b, k_adj = jax.random.split(key, 6)

    # Sparse feature matrix -> dense [nu, ne] (duplicates sum, like to_dense()).
    rows = jax.random.randint(k_r, (nnz,), 0, nu)
    cols = jax.random.randint(k_c, (nnz,), 0, ne)
    vals = jax.random.uniform(k_v, (nnz,), dtype=jnp.float32)
    x = jnp.zeros((nu, ne), jnp.float32).at[rows, cols].add(vals)

    # DenseFullyConnected parameters: xavier_uniform_ weight, uniform bias.
    xav = math.sqrt(6.0 / (ne + L))
    weight = jax.random.uniform(k_w, (ne, L), jnp.float32, -xav, xav)
    stdv = 1.0 / math.sqrt(L)
    bias = jax.random.uniform(k_b, (L,), jnp.float32, -stdv, stdv)

    # Adjacency: random row-normalized dense matrix raised to power K
    # (mirrors `.to_dense().matrix_power(args.K)` from the model __init__).
    adj0 = (jax.random.uniform(k_adj, (nu, nu), jnp.float32) < 0.1).astype(jnp.float32)
    adj0 = adj0 / jnp.maximum(adj0.sum(axis=1, keepdims=True), 1.0)
    adj = jnp.linalg.matrix_power(adj0, K).astype(jnp.float32)

    # 1) The DenseFullyConnected module itself (the spec'd forward).
    h = jax.block_until_ready(dense_fully_connected(x, weight, bias))
    h_ref = reference_fc(x, weight, bias)
    assert h.shape == (nu, L)
    assert jnp.allclose(h, h_ref, atol=1e-3, rtol=1e-3), (
        float(jnp.max(jnp.abs(h - h_ref))))

    # 2) Full APPNP-style use: log_softmax(adj^K @ (xW+b)).
    forward = build_appnp_forward(weight, bias, adj)
    out = jax.block_until_ready(forward(x))
    ref = reference_forward(x, weight, bias, adj)
    assert out.shape == (nu, L)
    assert jnp.allclose(out, ref, atol=1e-3, rtol=1e-3), (
        float(jnp.max(jnp.abs(out - ref))))

    print("KERNEL_OK")
</pallas_src>

<mosaic_0001>
module attributes {stable_mosaic.version = 11 : i64} {
  func.func @dense_fc_kernel(%arg0: i32, %arg1: i32, %arg2: memref<128x128xbf16, #tpu.memory_space<vmem>>, %arg3: memref<128x128xbf16, #tpu.memory_space<vmem>>, %arg4: memref<1x128xf32, #tpu.memory_space<vmem>>, %arg5: memref<128x128xf32, #tpu.memory_space<vmem>>, %arg6: memref<128x128xf32, #tpu.memory_space<vmem>>) attributes {dimension_semantics = [#tpu.dimension_semantics<parallel>, #tpu.dimension_semantics<arbitrary>], iteration_bounds = array<i64: 3, 3>, scalar_prefetch = 0 : i64, scratch_operands = 1 : i64, tpu.core_type = #tpu.core_type<tc>, window_params = [{transform_indices = @transform_0, window_bounds = array<i64: 128, 128>}, {transform_indices = @transform_1, window_bounds = array<i64: 128, 128>}, {pipeline_mode = #tpu.pipeline_mode<synchronous>, transform_indices = @transform_2, window_bounds = array<i64: 1, 128>}, {transform_indices = @transform_3, window_bounds = array<i64: 128, 128>}]} {
    %c0_i32 = arith.constant 0 : i32
    %0 = arith.cmpi eq, %arg1, %c0_i32 : i32
    %1 = arith.extui %0 : i1 to i32
    %c0_i32_0 = arith.constant 0 : i32
    %2 = arith.cmpi ne, %1, %c0_i32_0 : i32
    scf.if %2 {
      %cst_9 = arith.constant 0.000000e+00 : f32
      %12 = vector.broadcast %cst_9 : f32 to vector<128x128xf32>
      %c0_10 = arith.constant 0 : index
      %c0_11 = arith.constant 0 : index
      %13 = vector.load %arg6[%c0_10, %c0_11] : memref<128x128xf32, #tpu.memory_space<vmem>>, vector<128x128xf32>
      tpu.vector_store %arg6[%c0_10, %c0_11], %12 {strides = array<i32>} : memref<128x128xf32, #tpu.memory_space<vmem>>, vector<128x128xf32>,
    } else {
    }
    %c0 = arith.constant 0 : index
    %c0_1 = arith.constant 0 : index
    %3 = vector.load %arg6[%c0, %c0_1] : memref<128x128xf32, #tpu.memory_space<vmem>>, vector<128x128xf32>
    %c0_2 = arith.constant 0 : index
    %c0_3 = arith.constant 0 : index
    %4 = vector.load %arg2[%c0_2, %c0_3] : memref<128x128xbf16, #tpu.memory_space<vmem>>, vector<128x128xbf16>
    %c0_4 = arith.constant 0 : index
    %c0_5 = arith.constant 0 : index
    %5 = vector.load %arg3[%c0_4, %c0_5] : memref<128x128xbf16, #tpu.memory_space<vmem>>, vector<128x128xbf16>
    %cst = arith.constant dense<0.000000e+00> : vector<128x128xf32>
    %6 = tpu.matmul %4, %5, %cst {dimension_numbers = #tpu.dot_dimension_numbers<[1], [0], [0], [1], [0, 0, 1, 1], [], []>} : vector<128x128xbf16>, vector<128x128xbf16>, vector<128x128xf32> -> vector<128x128xf32>
    %7 = arith.addf %3, %6 : vector<128x128xf32>
    %c0_6 = arith.constant 0 : index
    %c0_7 = arith.constant 0 : index
    %8 = vector.load %arg6[%c0_6, %c0_7] : memref<128x128xf32, #tpu.memory_space<vmem>>, vector<128x128xf32>
    tpu.vector_store %arg6[%c0_6, %c0_7], %7 {strides = array<i32>} : memref<128x128xf32, #tpu.memory_space<vmem>>, vector<128x128xf32>,
    %c2_i32 = arith.constant 2 : i32
    %9 = arith.cmpi eq, %arg1, %c2_i32 : i32
    %10 = arith.extui %9 : i1 to i32
    %c0_i32_8 = arith.constant 0 : i32
    %11 = arith.cmpi ne, %10, %c0_i32_8 : i32
    scf.if %11 {
      %c0_9 = arith.constant 0 : index
      %c0_10 = arith.constant 0 : index
      %12 = vector.load %arg6[%c0_9, %c0_10] : memref<128x128xf32, #tpu.memory_space<vmem>>, vector<128x128xf32>
      %c0_11 = arith.constant 0 : index
      %c0_12 = arith.constant 0 : index
      %13 = vector.load %arg4[%c0_11, %c0_12] : memref<1x128xf32, #tpu.memory_space<vmem>>, vector<1x128xf32>
      %14 = vector.broadcast %13 : vector<1x128xf32> to vector<128x128xf32>
      %15 = arith.addf %12, %14 : vector<128x128xf32>
      %c0_13 = arith.constant 0 : index
      %c0_14 = arith.constant 0 : index
      %16 = vector.load %arg5[%c0_13, %c0_14] : memref<128x128xf32, #tpu.memory_space<vmem>>, vector<128x128xf32>
      tpu.vector_store %arg5[%c0_13, %c0_14], %15 {strides = array<i32>} : memref<128x128xf32, #tpu.memory_space<vmem>>, vector<128x128xf32>,
    } else {
    }
    return
  }
  func.func @transform_0(%arg0: i32, %arg1: i32) -> (i32, i32) {
    %c0_i32 = arith.constant 0 : i32
    return %arg0, %arg1 : i32, i32
  }
  func.func @transform_1(%arg0: i32, %arg1: i32) -> (i32, i32) {
    %c0_i32 = arith.constant 0 : i32
    %c0_i32_0 = arith.constant 0 : i32
    return %arg1, %c0_i32 : i32, i32
  }
  func.func @transform_2(%arg0: i32, %arg1: i32) -> (i32, i32) {
    %c0_i32 = arith.constant 0 : i32
    %c0_i32_0 = arith.constant 0 : i32
    %c0_i32_1 = arith.constant 0 : i32
    return %c0_i32, %c0_i32_0 : i32, i32
  }
  func.func @transform_3(%arg0: i32, %arg1: i32) -> (i32, i32) {
    %c0_i32 = arith.constant 0 : i32
    %c0_i32_0 = arith.constant 0 : i32
    return %arg0, %c0_i32 : i32, i32
  }
}

</mosaic_0001>

<bundles_post_ra>
// kernel: tpu_custom_call.1
= control target key start
LH: loop header
LB: loop body
LE: loop exit
PB: predicated region body
PF: predicated region fallthrough
CT: control target
= control target key end

     0   :  { %s1613_s0 = inlined_call_operand.hbm [shape: bf16[384,384], index: 0, kind: input, shape index: {}]   ;;  %s1614_s1 = inlined_call_operand.hbm [shape: bf16[384,128], index: 1, kind: input, shape index: {}]   ;;  %s1615_s2 = inlined_call_operand.vmem [shape: f32[1,128], index: 2, kind: input, shape index: {}]   ;;  %s1616_s3 = inlined_call_operand.hbm [shape: f32[384,128], index: 3, kind: output, shape index: {}]  }
   0x1   :  { %1629 = sst [smem:[#allocation17_spill]] %s1613_s0 }
   0x2   :  { %1630 = sst [smem:[#allocation18_spill]] %s1615_s2 }
   0x3   :  { %1631 = sst [smem:[#allocation19_spill]] %s1616_s3 }
   0x4   :  { %8 = vsyncpa [#allocation4], 0 }
   0x5   :  { %10 = vsyncpa [#allocation4 + $0x1], 0 }
   0x6   :  { %11 = vsyncpa [#allocation7], 0 }
   0x7   :  { %13 = vsyncpa [#allocation7 + $0x1], 0 }
   0x8   :  { %14 = vsyncpa [#allocation5], 0 }
   0x9   :  { %16 = vsyncpa [#allocation5 + $0x1], 0  ;;  %s1224_s12 = smov 0   ;;  %s1226_s13 = smov 0  }
   0xa   :  { %s1228_s14 = smov 0   ;;  %s1230_s15 = smov 0  }
   0xb   :  { %s1232_s16 = smov 0   ;;  %s1234_s17 = smov 0  }
   0xc   :  { %s1236_s18 = smov 0   ;;  %s1238_s19 = smov 0  }
   0xd   :  { %s1240_s20 = smov 0   ;;  %s1242_s21 = smov 0  }
   0xe   :  { %s1244_s22 = smov 0   ;;  %s1246_s23 = smov 0  }
   0xf   :  { %s1248_s24 = smov 0   ;;  %s1250_s25 = smov 0  }
  0x10 LB: > { %1632 = sst [smem:[#allocation12_spill]] %s1181_s22  ;;  %s31_s26 = sadd.s32 1, %s1185_s23  ;;  %s1193_s25 = sphi %s1250_s25, %s22_s25   ;;  %s1189_s24 = sphi %s1248_s24, %s1663_s24   ;;  %s1185_s23 = sphi %s1246_s23, %s1662_s23   ;;  %s1181_s22 = sphi %s1244_s22, %s1661_s22   ;;  %s1177_s21 = sphi %s1242_s21, %s1660_s21   ;;  %s1173_s20 = sphi %s1240_s20, %s1672_s20   ;;  %s1169_s19 = sphi %s1238_s19, %s1671_s19   ;;  %s1165_s18 = sphi %s1236_s18, %s1670_s18   ;;  %s1161_s17 = sphi %s1234_s17, %s1669_s17   ;;  %s1157_s16 = sphi %s1232_s16, %s1668_s16   ;;  %s1153_s15 = sphi %s1230_s15, %s1667_s15   ;;  %s1149_s14 = sphi %s1228_s14, %s1666_s14   ;;  %s1145_s13 = sphi %s1226_s13, %s1665_s13   ;;  %s1141_s12 = sphi %s1224_s12, %s1664_s12  }
  0x11   : > { %1633 = sst [smem:[#allocation13_spill]] %s1185_s23  ;;  %s34_s27 = sadd.s32 1, %s1189_s24 }
  0x12   : > { %1634 = sst [smem:[#allocation14_spill]] %s1189_s24  ;;  %p32_p0 = scmp.ge.s32.totalorder %s31_s26, 3 }
  0x13   : > { %s43_s28 = sadd.s32 1, %s1173_s20  ;;  %p50_p1 = scmp.ne.s32.totalorder %s1173_s20, %s1169_s19 }
  0x14   : > { %p1621_p2 = scmp.eq.s32.totalorder %s1193_s25, 0  ;;  %s1674_s26 = smov (%p32_p0, %s31_s26), 0 }
  0x15   : > { %1635 = sst [smem:[#allocation15_spill]] %s1674_s26  ;;  %s1676_s27 = smov (!%p32_p0, %s34_s27), %s1189_s24 }
  0x16   : > { %s1305_s29 = ssub.s32 %s1185_s23, %s1674_s26  ;;  %p1309_p3 = por %p1621_p2, %p50_p1 }
  0x17   : > { %p36_p4 = scmp.ge.s32.totalorder %s1676_s27, 3  ;;  %s116_s4 = sadd.s32 1, %s1149_s14 }
  0x18   : > { %p1620_p7 = scmp.lt.s32.totalorder %s1193_s25, 9  ;;  %s156_s6 = sand.u32 1, %s1173_s20  }
  0x19   : > { %s1678_s27 = smov (%p36_p4, %s1676_s27), 0  ;;  %s728_s10 = sshll.u32 %s156_s6, 6 }
  0x1a   : > { %1637 = sst [smem:[#allocation16_spill]] %s1678_s27  ;;  %s38_s5 = ssub.s32 %s1189_s24, %s1678_s27 }
  0x1b   : > { %s40_s7 = sor.u32 %s1305_s29, %s38_s5  ;;  %p114_p8 = scmp.eq.s32.totalorder %s38_s5, 0 }
  0x1c   : > { %p41_p9 = scmp.eq.s32.totalorder %s40_s7, 0  ;;  %s829_s11 = smul.u32 48, %s1189_s24 }
  0x1d   : > { %s1325_s8 = scalar_select %p114_p8, %s1149_s14, %s116_s4  }
  0x1e   : > { %s1328_s9 = scalar_select %p41_p9, %s1173_s20, %s43_s28  }
  0x1f   : > { %p1335_p10 = pnand %p1620_p7, %p1309_p3  ;;  %s166_s27 = sadd.s32 %s1185_s23, %s829_s11 }
  0x20   : > { %s160_s3 = scalar_lea.vmem [#allocation3], %s728_s10  ;;  %s731_s2 = sshll.u32 %s166_s27, 6 }
  0x21   : > { %s169_s22 = sshll.u32 %s160_s3, 4  ;;  %s1639_s0 = sld [smem:[#allocation17_spill]]  ;;  %s1340_s22 = int_to_ptr.vmem [resolvable:$true] %s169_s22 }
  0x22   : > { %p735_p11 = scmp.ge.s32.totalorder %s1193_s25, 1  ;;  %s1348_s30 = scalar_lea.sflag [#allocation4], %s156_s6 }
  0x23   : > { %p985_p13 = pneg %p1335_p10 }
  0x27   : > { %s1345_s28 = scalar_lea.hbm %s1639_s0, %s731_s2  ;;  %s988_s2 = scalar_lea.hbm %s1639_s0, 9216 }
  0x28   : > { %s983_s7 = scalar_lea.hbm %s1345_s28, 1024  ;;  %p989_p3 = scmp.lt.u32.totalorder %s1345_s28, %s1639_s0 }
  0x29   : > { %p984_p12 = scmp.ne.s32.totalorder %s1345_s28, %s983_s7  ;;  %p990_p4 = scmp.lt.u32.totalorder %s988_s2, %s983_s7 }
  0x2a   : > { %p992_p9 = scmp.lt.u32.totalorder %s983_s7, %s1345_s28 }
  0x2b   : > { %p986_p0 = pnand %p985_p13, %p984_p12  ;;  %p991_p8 = por %p990_p4, %p989_p3 }
  0x2d   : > { %p987_p1 = pneg %p986_p0  ;;  %p993_p7 = por %p992_p9, %p991_p8 }
  0x2f   : > { %p994_p2 = pnand %p993_p7, %p987_p1 }
  0x31   : > { %997 = shalt.err (!%p994_p2)
}
  0x32   : > { %s998_s6 = scalar_lea.vmem %s1340_s22, 1024  ;;  %s1195_s4 = smov [#allocation3]  }
  0x33   : > { %p999_p12 = scmp.ne.s32.totalorder %s1340_s22, %s998_s6  ;;  %s1003_s5 = sshll.u32 %s1195_s4, 4  ;;  %s1004_s5 = int_to_ptr.vmem [resolvable:$false] %s1003_s5 }
  0x34   : > { %s1005_s3 = scalar_lea.vmem %s1004_s5, 2048  ;;  %p1006_p6 = scmp.lt.s32.totalorder %s1340_s22, %s1004_s5 }
  0x35   : > { %p1001_p0 = pnand %p999_p12, %p985_p13  ;;  %p1007_p3 = scmp.lt.s32.totalorder %s1005_s3, %s998_s6 }
  0x37   : > { %p1002_p5 = pneg %p1001_p0  ;;  %p1008_p4 = por %p1007_p3, %p1006_p6 }
  0x39   : > { %p1009_p8 = pnand %p1008_p4, %p1002_p5 }
  0x3b   : > { %1012 = shalt.err (!%p1009_p8)
}
  0x3c   : > { %s1196_s7 = smov 192   ;;  %s1622_s27 = smov 64  }
  0x3d   : > { %s1623_s2 = smov 4   ;;  %p198_p2 = scmp.lt.s32.totalorder %s1193_s25, 10 }
  0x3e   : > { %839 = dma.hbm_to_vmem [thread:$0]  (!%p1335_p10), %s1345_s28, 1024, %s1340_s22, %s1348_s30, %s1196_s7, %s1622_s27, %s1623_s2  }
  0x3f   : > { %p1381_p5 = pnand %p735_p11, %p198_p2  ;;  %s724_s11 = sadd.s32 4294967295, %s1193_s25  }
  0x40   : > { %s725_s6 = sadd.s32 4294967294, %s1193_s25   ;;  %p57_p6 = scmp.eq.s32.totalorder %s724_s11, 0 }
  0x41   : > { %s69_s4 = sadd.s32 1, %s1161_s17  ;;  %p1641_p7 = scmp.eq.s32.totalorder %s1305_s29, 0 }
  0x42   : > { %p1642_p13 = scmp.ne.s32.totalorder %s1169_s19, %s1165_s18  ;;  %p76_p10 = scmp.ne.s32.totalorder %s1161_s17, %s1157_s16 }
  0x43   : > { %s1391_s5 = scalar_select %p1641_p7, %s1161_s17, %s69_s4  }
  0x44   : > { %p1396_p1 = por %p57_p6, %p1642_p13  ;;  %p82_p11 = scmp.ne.s32.totalorder %s1157_s16, %s1153_s15 }
  0x45   : > { %p126_p9 = scmp.ne.s32.totalorder %s1149_s14, %s1145_s13  ;;  %p1644_p12 = scmp.eq.s32.totalorder %s1193_s25, 0 }
  0x46   : > { %s1643_s26 = scalar_select %p1396_p1, 1, 0 }
  0x47   : > { %p78_p0 = por %p76_p10, %p1644_p12  ;;  %p127_p3 = scmp.eq.s32.totalorder %s724_s11, 8 }
  0x48   : > { %p1408_p4 = por %p82_p11, %p57_p6  ;;  %p132_p8 = scmp.ne.s32.totalorder %s1145_s13, %s1141_s12 }
  0x49   : > { %p1414_p2 = por %p127_p3, %p126_p9  ;;  %p133_p7 = scmp.eq.s32.totalorder %s725_s6, 8 }
  0x4a   : > { %s1645_s22 = scalar_select %p1408_p4, 1, 0 }
  0x4b   : > { %s1646_s29 = scalar_select %p1414_p2, 1, 0 }
  0x4c   : > { %s179_s18 = sand.u32 1, %s1161_s17   ;;  %s763_s28 = sshll.u32 %s1185_s23, 10 }
  0x4d   : > { %p1420_p13 = por %p133_p7, %p132_p8  ;;  %s732_s15 = sshll.u32 %s179_s18, 6 }
  0x4e   : > { %s1427_s11 = scalar_lea.hbm %s1614_s1, %s763_s28  ;;  %p1648_p6 = scmp.lt.s32.totalorder %s1193_s25, 9 }
  0x4f   : > { %s1647_s30 = scalar_select %p1420_p13, 1, 0 }
  0x50   : > { %p1431_p10 = pnand %p1648_p6, %p78_p0  ;;  %s183_s6 = scalar_lea.vmem [#allocation6], %s732_s15 }
  0x51   : > { %s190_s27 = sshll.u32 %s183_s6, 4  ;;  %s1437_s2 = scalar_lea.sflag [#allocation7], %s179_s18  ;;  %s1435_s27 = int_to_ptr.vmem [resolvable:$true] %s190_s27 }
  0x52   : > { %s1013_s3 = scalar_lea.hbm %s1427_s11, 1024  ;;  %p1015_p9 = pneg %p1431_p10 }
  0x53   : > { %p1014_p11 = scmp.ne.s32.totalorder %s1427_s11, %s1013_s3  ;;  %s1018_s0 = scalar_lea.hbm %s1614_s1, 3072 }
  0x54   : > { %p1019_p0 = scmp.lt.u32.totalorder %s1427_s11, %s1614_s1  ;;  %p1020_p8 = scmp.lt.u32.totalorder %s1018_s0, %s1013_s3 }
  0x55   : > { %p1016_p12 = pnand %p1015_p9, %p1014_p11  ;;  %p1022_p6 = scmp.lt.u32.totalorder %s1013_s3, %s1427_s11 }
  0x56   : > { %p1021_p7 = por %p1020_p8, %p1019_p0 }
  0x57   : > { %p1017_p3 = pneg %p1016_p12 }
  0x58   : > { %p1023_p13 = por %p1022_p6, %p1021_p7 }
  0x5a   : > { %p1024_p2 = pnand %p1023_p13, %p1017_p3 }
  0x5c   : > { %1027 = shalt.err (!%p1024_p2)
}
  0x5d   : > { %s1028_s18 = scalar_lea.vmem %s1435_s27, 1024  ;;  %s1199_s15 = smov [#allocation6]  }
  0x5e   : > { %p1029_p11 = scmp.ne.s32.totalorder %s1435_s27, %s1028_s18  ;;  %s1033_s6 = sshll.u32 %s1199_s15, 4  ;;  %s1034_s6 = int_to_ptr.vmem [resolvable:$false] %s1033_s6 }
  0x5f   : > { %s1035_s23 = scalar_lea.vmem %s1034_s6, 2048  ;;  %p1036_p1 = scmp.lt.s32.totalorder %s1435_s27, %s1034_s6 }
  0x60   : > { %p1031_p12 = pnand %p1029_p11, %p1015_p9  ;;  %p1037_p0 = scmp.lt.s32.totalorder %s1035_s23, %s1028_s18 }
  0x62   : > { %p1032_p4 = pneg %p1031_p12  ;;  %p1038_p8 = por %p1037_p0, %p1036_p1 }
  0x64   : > { %p1039_p7 = pnand %p1038_p8, %p1032_p4 }
  0x66   : > { %1042 = shalt.err (!%p1039_p7)
}
  0x67   : > { %s1650_s0 = smov 4   ;;  %s1651_s24 = smov 64  }
  0x68   : > { %842 = dma.hbm_to_vmem [thread:$0]  (!%p1431_p10), %s1427_s11, 1024, %s1435_s27, %s1437_s2, %s1651_s24, %s1651_s24, %s1650_s0  }
  0x69   : > { %202 = sbr.rel (%p1381_p5) target bundleno = 425 (0x1a9), region = 32  ;;  %s204_s3 = sand.u32 (!%p1381_p5), 1, %s1169_s19  }
  0x6a   : > { %s736_s28 = sshll.u32 (!%p1381_p5), %s204_s3, 6  ;;  %s205_s7 = scalar_lea.sflag (!%p1381_p5), [#allocation4], %s204_s3 }
  0x6b   : > { %s1471_s18 = scalar_lea.vmem (!%p1381_p5), [#allocation3], %s736_s28  ;;  %p1652_p1 = scmp.ne.s32.totalorder (!%p1381_p5), %s1643_s26, 0 }
  0x70   : > { %1128 = dma.done.wait (%p1652_p1), %s205_s7, 1024  }
  0x71   : > { %1130 = vsyncadd (%p1652_p1), %s205_s7, 4294966272  ;;  %s213_s4 = sand.u32 1, %s1157_s16   ;;  %p1653_p5 = scmp.ne.s32.totalorder %s1645_s22, 0 }
  0x72   : > { %s737_s15 = sshll.u32 %s213_s4, 6  ;;  %s214_s27 = scalar_lea.sflag [#allocation7], %s213_s4 }
  0x73   : > { %s1478_s2 = scalar_lea.vmem [#allocation6], %s737_s15 }
  0x74   : > { %1132 = dma.done.wait (%p1653_p5), %s214_s27, 1024  }
  0x75   : > { %1134 = vsyncadd (%p1653_p5), %s214_s27, 4294966272  ;;  %s242_s10 = sand.u32 1, %s1145_s13   ;;  %p739_p4 = scmp.ne.s32.totalorder %s1177_s21, 0 }
  0x76   : > { %s738_s11 = sshll.u32 %s242_s10, 7  ;;  %v1200_v0 = vmov (!%p739_p4), 0.0  }
  0x77   : > { %s1487_s6 = scalar_lea.vmem [#allocation8], %s738_s11  ;;  %252 = sbr.rel (%p739_p4) target bundleno = 127 (0x7f), region = 44  ;;  %253 = vst [vmem:[#allocation2] sm:$0xff] (!%p739_p4), %v1200_v0  ;;  %254 = vst [vmem:[#allocation2 + $0x8] sm:$0xff] (!%p739_p4), %v1200_v0 }
  0x78   : > { %255 = vst [vmem:[#allocation2 + $0x10] sm:$0xff] (!%p739_p4), %v1200_v0  ;;  %256 = vst [vmem:[#allocation2 + $0x18] sm:$0xff] (!%p739_p4), %v1200_v0 }
  0x79   : > { %257 = vst [vmem:[#allocation2 + $0x20] sm:$0xff] (!%p739_p4), %v1200_v0  ;;  %258 = vst [vmem:[#allocation2 + $0x28] sm:$0xff] (!%p739_p4), %v1200_v0 }
  0x7a   : > { %259 = vst [vmem:[#allocation2 + $0x30] sm:$0xff] (!%p739_p4), %v1200_v0  ;;  %260 = vst [vmem:[#allocation2 + $0x38] sm:$0xff] (!%p739_p4), %v1200_v0 }
  0x7b   : > { %261 = vst [vmem:[#allocation2 + $0x40] sm:$0xff] (!%p739_p4), %v1200_v0  ;;  %262 = vst [vmem:[#allocation2 + $0x48] sm:$0xff] (!%p739_p4), %v1200_v0 }
  0x7c   : > { %263 = vst [vmem:[#allocation2 + $0x50] sm:$0xff] (!%p739_p4), %v1200_v0  ;;  %264 = vst [vmem:[#allocation2 + $0x58] sm:$0xff] (!%p739_p4), %v1200_v0 }
  0x7d   : > { %265 = vst [vmem:[#allocation2 + $0x60] sm:$0xff] (!%p739_p4), %v1200_v0  ;;  %266 = vst [vmem:[#allocation2 + $0x68] sm:$0xff] (!%p739_p4), %v1200_v0 }
  0x7e   : > { %267 = vst [vmem:[#allocation2 + $0x70] sm:$0xff] %v1200_v0  ;;  %268 = vst [vmem:[#allocation2 + $0x78] sm:$0xff] %v1200_v0 }
  0x7f PF: > { %v967_v1 = vld [vmem:[%s1478_s2] sm:$0xff]   ;;  %v968_v2 = vld [vmem:[%s1478_s2 + $0x8] sm:$0xff]   ;;  %v969_v3 = vld [vmem:[%s1478_s2 + $0x10] sm:$0xff]   ;;  %p756_p2 = scmp.ne.s32.totalorder %s1177_s21, 2 }
  0x80   : > { %781 = vmatprep.subr.bf16.mxu0 %v967_v1  ;;  %813 = vmatprep.subr.bf16.mxu1 %v967_v1  ;;  %v970_v4 = vld [vmem:[%s1478_s2 + $0x18] sm:$0xff]   ;;  %v975_v5 = vld [vmem:[%s1471_s18] sm:$0xff]   ;;  %v972_v8 = vld [vmem:[%s1478_s2 + $0x28] sm:$0xff]   ;;  %s1654_s23 = sld [smem:[#allocation18_spill]] (!%p756_p2) }
  0x81   : > { %782 = vmatpush3.bf16.msra.mxu0 %v967_v1  ;;  %821 = vmatpush3.bf16.msra.mxu1 %v967_v1  ;;  %v976_v6 = vld [vmem:[%s1471_s18 + $0x20] sm:$0xff]   ;;  %v973_v9 = vld [vmem:[%s1478_s2 + $0x30] sm:$0xff]   ;;  %v974_v10 = vld [vmem:[%s1478_s2 + $0x38] sm:$0xff]  }
  0x82   : > { %783 = vmatprep.subr.bf16.mxu0 %v968_v2  ;;  %814 = vmatprep.subr.bf16.mxu1 %v968_v2  ;;  %v971_v7 = vld [vmem:[%s1478_s2 + $0x20] sm:$0xff]   ;;  %v977_v11 = vld [vmem:[%s1471_s18 + $0x8] sm:$0xff]   ;;  %v979_v13 = vld [vmem:[%s1471_s18 + $0x10] sm:$0xff]  }
  0x83   : > { %797 = vmatprep.mubr.bf16.mxu0 %v975_v5  ;;  %805 = vmatprep.mubr.bf16.mxu1 %v976_v6  ;;  %v978_v12 = vld [vmem:[%s1471_s18 + $0x28] sm:$0xff]   ;;  %v980_v14 = vld [vmem:[%s1471_s18 + $0x30] sm:$0xff]   ;;  %v981_v15 = vld [vmem:[%s1471_s18 + $0x18] sm:$0xff]  }
  0x84   : > { %v982_v16 = vld [vmem:[%s1471_s18 + $0x38] sm:$0xff]   ;;  %v271_v17 = vld [vmem:[#allocation2 + $0x10] sm:$0xff]  ;;  %v269_v19 = vld [vmem:[#allocation2] sm:$0xff] }
  0x85   : > { %784 = vmatpush3.bf16.msra.mxu0 %v968_v2  ;;  %822 = vmatpush3.bf16.msra.mxu1 %v968_v2  ;;  %v279_v18 = vld [vmem:[#allocation2 + $0x50] sm:$0xff]  ;;  %v277_v20 = vld [vmem:[#allocation2 + $0x40] sm:$0xff]  ;;  %v272_v23 = vld [vmem:[#allocation2 + $0x18] sm:$0xff] }
  0x86   : > { %785 = vmatprep.subr.bf16.mxu0 %v969_v3  ;;  %815 = vmatprep.subr.bf16.mxu1 %v969_v3  ;;  %v280_v24 = vld [vmem:[#allocation2 + $0x58] sm:$0xff]  ;;  %v270_v29 = vld [vmem:[#allocation2 + $0x8] sm:$0xff]  ;;  %v275_v41 = vld [vmem:[#allocation2 + $0x30] sm:$0xff] }
  0x87   : > { %v278_v30 = vld [vmem:[#allocation2 + $0x48] sm:$0xff]  ;;  %v283_v42 = vld [vmem:[#allocation2 + $0x70] sm:$0xff]  ;;  %v273_v43 = vld [vmem:[#allocation2 + $0x20] sm:$0xff] }
  0x88   : > { %v281_v44 = vld [vmem:[#allocation2 + $0x60] sm:$0xff]  ;;  %v276_v47 = vld [vmem:[#allocation2 + $0x38] sm:$0xff]  ;;  %v274_v53 = vld [vmem:[#allocation2 + $0x28] sm:$0xff] }
  0x89   : > { %786 = vmatpush3.bf16.msra.mxu0 %v969_v3  ;;  %823 = vmatpush3.bf16.msra.mxu1 %v969_v3  ;;  %v284_v48 = vld [vmem:[#allocation2 + $0x78] sm:$0xff]  ;;  %v282_v54 = vld [vmem:[#allocation2 + $0x68] sm:$0xff]  ;;  %v757_v2 = vld [vmem:[%s1654_s23] ss:$0 sm:$0xff] (!%p756_p2) }
  0x8a   : > { %787 = vmatprep.subr.bf16.mxu0 %v970_v4  ;;  %816 = vmatprep.subr.bf16.mxu1 %v970_v4 }
  0x8d   : > { %788 = vmatpush3.bf16.msra.mxu0 %v970_v4  ;;  %824 = vmatpush3.bf16.msra.mxu1 %v970_v4 }
  0x8e   : > { %789 = vmatprep.subr.bf16.mxu0 %v971_v7  ;;  %817 = vmatprep.subr.bf16.mxu1 %v971_v7 }
  0x91   : > { %790 = vmatpush3.bf16.msra.mxu0 %v971_v7  ;;  %825 = vmatpush3.bf16.msra.mxu1 %v971_v7 }
  0x92   : > { %791 = vmatprep.subr.bf16.mxu0 %v972_v8  ;;  %818 = vmatprep.subr.bf16.mxu1 %v972_v8 }
  0x95   : > { %792 = vmatpush3.bf16.msra.mxu0 %v972_v8  ;;  %826 = vmatpush3.bf16.msra.mxu1 %v972_v8 }
  0x96   : > { %793 = vmatprep.subr.bf16.mxu0 %v973_v9  ;;  %819 = vmatprep.subr.bf16.mxu1 %v973_v9 }
  0x99   : > { %794 = vmatpush3.bf16.msra.mxu0 %v973_v9  ;;  %827 = vmatpush3.bf16.msra.mxu1 %v973_v9 }
  0x9a   : > { %795 = vmatprep.subr.bf16.mxu0 %v974_v10  ;;  %820 = vmatprep.subr.bf16.mxu1 %v974_v10 }
  0x9d   : > { %796 = vmatpush3.bf16.msra.mxu0 %v974_v10  ;;  %828 = vmatpush3.bf16.msra.mxu1 %v974_v10 }
  0xa0   : > { %798 = vmatmul.mubr.bf16.vlgmr.msra.gmra.mrb[0].mxu0 %v977_v11  ;;  %806 = vmatmul.mubr.bf16.vlgmr.msra.gmra.mrb[0].mxu1 %v978_v12 }
  0xa1   : > { %801 = vmatprep.mubr.bf16.mxu0 %v979_v13  ;;  %809 = vmatprep.mubr.bf16.mxu1 %v980_v14 }
  0xa8   : > { %802 = vmatmul.mubr.bf16.gmra.mrb[4].mxu0 %v981_v15  ;;  %810 = vmatmul.mubr.bf16.gmra.mrb[4].mxu1 %v982_v16 }
 0x173   : > { %v799_v21 = vpop.f32.mrb[0].mxu0  ;;  %v807_v22 = vpop.f32.mrb[0].mxu1 }
 0x174   : > { %v512_v25 = vadd.f32 %v799_v21, %v271_v17  ;;  %v520_v26 = vadd.f32 %v807_v22, %v279_v18  ;;  %v447_v27 = vpop.f32.mrb[1].mxu0  ;;  %v479_v28 = vpop.f32.mrb[1].mxu1 }
 0x175   : > { %v510_v31 = vadd.f32 %v447_v27, %v269_v19  ;;  %v518_v32 = vadd.f32 %v479_v28, %v277_v20  ;;  %v800_v33 = vpop.f32.mrb[2].mxu0  ;;  %v808_v34 = vpop.f32.mrb[2].mxu1 }
 0x176   : > { %528 = vst [vmem:[#allocation2 + $0x10] sm:$0xff] %v512_v25  ;;  %536 = vst [vmem:[#allocation2 + $0x50] sm:$0xff] %v520_v26  ;;  %v513_v35 = vadd.f32 %v800_v33, %v272_v23  ;;  %v521_v36 = vadd.f32 %v808_v34, %v280_v24  ;;  %v450_v37 = vpop.f32.mrb[3].mxu0  ;;  %v482_v38 = vpop.f32.mrb[3].mxu1 }
 0x177   : > { %526 = vst [vmem:[#allocation2] sm:$0xff] %v510_v31  ;;  %534 = vst [vmem:[#allocation2 + $0x40] sm:$0xff] %v518_v32  ;;  %v511_v39 = vadd.f32 %v450_v37, %v270_v29  ;;  %v519_v40 = vadd.f32 %v482_v38, %v278_v30 }
 0x178   : > { %529 = vst [vmem:[#allocation2 + $0x18] sm:$0xff] %v513_v35  ;;  %537 = vst [vmem:[#allocation2 + $0x58] sm:$0xff] %v521_v36 }
 0x179   : > { %527 = vst [vmem:[#allocation2 + $0x8] sm:$0xff] %v511_v39  ;;  %535 = vst [vmem:[#allocation2 + $0x48] sm:$0xff] %v519_v40 }
 0x17b   : > { %v803_v45 = vpop.f32.mrb[4].mxu0  ;;  %v811_v46 = vpop.f32.mrb[4].mxu1  ;;  %545 = sbr.rel (%p756_p2) target bundleno = 397 (0x18d), region = 48 }
 0x17c   : > { %v516_v49 = vadd.f32 %v803_v45, %v275_v41  ;;  %v524_v50 = vadd.f32 %v811_v46, %v283_v42  ;;  %v463_v51 = vpop.f32.mrb[5].mxu0  ;;  %v495_v52 = vpop.f32.mrb[5].mxu1 }
 0x17d   : > { %v514_v55 = vadd.f32 %v463_v51, %v273_v43  ;;  %v522_v56 = vadd.f32 %v495_v52, %v281_v44  ;;  %v804_v57 = vpop.f32.mrb[6].mxu0  ;;  %v812_v58 = vpop.f32.mrb[6].mxu1  ;;  %v548_v6 = vld [vmem:[#allocation2 + $0x10] sm:$0xff] (!%p756_p2) }
 0x17e   : > { %532 = vst [vmem:[#allocation2 + $0x30] sm:$0xff] %v516_v49  ;;  %540 = vst [vmem:[#allocation2 + $0x70] sm:$0xff] %v524_v50  ;;  %v517_v59 = vadd.f32 %v804_v57, %v276_v47  ;;  %v525_v60 = vadd.f32 %v812_v58, %v284_v48  ;;  %v466_v61 = vpop.f32.mrb[7].mxu0  ;;  %v498_v62 = vpop.f32.mrb[7].mxu1  ;;  %v546_v1 = vld [vmem:[#allocation2] sm:$0xff] (!%p756_p2)  ;;  %v571_v9 = vadd.f32 (!%p756_p2), %v757_v2, %v548_v6  ;;  %v556_v20 = vld [vmem:[#allocation2 + $0x50] sm:$0xff] (!%p756_p2) }
 0x17f   : > { %530 = vst [vmem:[#allocation2 + $0x20] sm:$0xff] %v514_v55  ;;  %538 = vst [vmem:[#allocation2 + $0x60] sm:$0xff] %v522_v56  ;;  %v515_v63 = vadd.f32 %v466_v61, %v274_v53  ;;  %v523_v0 = vadd.f32 %v498_v62, %v282_v54  ;;  %v569_v4 = vadd.f32 (!%p756_p2), %v757_v2, %v546_v1  ;;  %v549_v7 = vld [vmem:[#allocation2 + $0x18] sm:$0xff] (!%p756_p2)  ;;  %v554_v18 = vld [vmem:[#allocation2 + $0x40] sm:$0xff] (!%p756_p2) }
 0x180   : > { %533 = vst [vmem:[#allocation2 + $0x38] sm:$0xff] %v517_v59  ;;  %541 = vst [vmem:[#allocation2 + $0x78] sm:$0xff] %v525_v60  ;;  %v547_v3 = vld [vmem:[#allocation2 + $0x8] sm:$0xff] (!%p756_p2)  ;;  %v572_v10 = vadd.f32 (!%p756_p2), %v757_v2, %v549_v7  ;;  %v577_v21 = vadd.f32 (!%p756_p2), %v757_v2, %v554_v18  ;;  %v579_v23 = vadd.f32 (!%p756_p2), %v757_v2, %v556_v20  ;;  %v557_v24 = vld [vmem:[#allocation2 + $0x58] sm:$0xff] (!%p756_p2) }
 0x181   : > { %531 = vst [vmem:[#allocation2 + $0x28] sm:$0xff] %v515_v63  ;;  %539 = vst [vmem:[#allocation2 + $0x68] sm:$0xff] %v523_v0  ;;  %v570_v5 = vadd.f32 (!%p756_p2), %v757_v2, %v547_v3  ;;  %v555_v19 = vld [vmem:[#allocation2 + $0x48] sm:$0xff] (!%p756_p2)  ;;  %v580_v27 = vadd.f32 (!%p756_p2), %v757_v2, %v557_v24 }
 0x182   : > { %585 = vst [vmem:[%s1487_s6] sm:$0xff] %v569_v4  ;;  %587 = vst [vmem:[%s1487_s6 + $0x10] sm:$0xff] %v571_v9  ;;  %v578_v22 = vadd.f32 %v757_v2, %v555_v19 }
 0x183   : > { %586 = vst [vmem:[%s1487_s6 + $0x8] sm:$0xff] %v570_v5  ;;  %588 = vst [vmem:[%s1487_s6 + $0x18] sm:$0xff] %v572_v10 }
 0x184   : > { %593 = vst [vmem:[%s1487_s6 + $0x40] sm:$0xff] %v577_v21  ;;  %594 = vst [vmem:[%s1487_s6 + $0x48] sm:$0xff] %v578_v22 }
 0x185   : > { %v552_v13 = vld [vmem:[#allocation2 + $0x30] sm:$0xff]  ;;  %595 = vst [vmem:[%s1487_s6 + $0x50] sm:$0xff] %v579_v23  ;;  %596 = vst [vmem:[%s1487_s6 + $0x58] sm:$0xff] %v580_v27 }
 0x186   : > { %v550_v8 = vld [vmem:[#allocation2 + $0x20] sm:$0xff]  ;;  %v575_v16 = vadd.f32 %v757_v2, %v552_v13  ;;  %v560_v30 = vld [vmem:[#allocation2 + $0x70] sm:$0xff] }
 0x187   : > { %v573_v11 = vadd.f32 %v757_v2, %v550_v8  ;;  %v553_v14 = vld [vmem:[#allocation2 + $0x38] sm:$0xff]  ;;  %v558_v25 = vld [vmem:[#allocation2 + $0x60] sm:$0xff]  ;;  %v583_v32 = vadd.f32 %v757_v2, %v560_v30 }
 0x188   : > { %v551_v12 = vld [vmem:[#allocation2 + $0x28] sm:$0xff]  ;;  %v576_v17 = vadd.f32 %v757_v2, %v553_v14  ;;  %591 = vst [vmem:[%s1487_s6 + $0x30] sm:$0xff] %v575_v16  ;;  %v581_v28 = vadd.f32 %v757_v2, %v558_v25  ;;  %v561_v31 = vld [vmem:[#allocation2 + $0x78] sm:$0xff] }
 0x189   : > { %v574_v15 = vadd.f32 %v757_v2, %v551_v12  ;;  %589 = vst [vmem:[%s1487_s6 + $0x20] sm:$0xff] %v573_v11  ;;  %v559_v26 = vld [vmem:[#allocation2 + $0x68] sm:$0xff]  ;;  %v584_v33 = vadd.f32 %v757_v2, %v561_v31  ;;  %599 = vst [vmem:[%s1487_s6 + $0x70] sm:$0xff] %v583_v32 }
 0x18a   : > { %592 = vst [vmem:[%s1487_s6 + $0x38] sm:$0xff] %v576_v17  ;;  %v582_v29 = vadd.f32 %v757_v2, %v559_v26  ;;  %597 = vst [vmem:[%s1487_s6 + $0x60] sm:$0xff] %v581_v28 }
 0x18b   : > { %590 = vst [vmem:[%s1487_s6 + $0x28] sm:$0xff] %v574_v15  ;;  %600 = vst [vmem:[%s1487_s6 + $0x78] sm:$0xff] %v584_v33 }
 0x18c   : > { %598 = vst [vmem:[%s1487_s6 + $0x68] sm:$0xff] %v582_v29 }
 0x18d PF: > { %s1655_s21 = sld [smem:[#allocation12_spill]]  ;;  %s1656_s28 = sld [smem:[#allocation19_spill]] }
 0x18e   : > { %s615_s18 = sshll.u32 %s1487_s6, 4  ;;  %s1537_s4 = scalar_lea.sflag [#allocation5], %s242_s10  ;;  %s1533_s18 = int_to_ptr.vmem [resolvable:$true] %s615_s18 }
 0x18f   : > { %s1043_s15 = scalar_lea.vmem %s1533_s18, 2048  ;;  %p1657_p10 = scmp.ne.s32.totalorder %s1646_s29, 0 }
 0x190   : > { %p1044_p13 = scmp.ne.s32.totalorder %s1533_s18, %s1043_s15  ;;  %s1201_s27 = smov [#allocation8]  }
 0x191   : > { %s1047_s2 = sshll.u32 %s1201_s27, 4  ;;  %s1048_s2 = int_to_ptr.vmem [resolvable:$false] %s1047_s2 }
 0x192   : > { %p1045_p9 = pnand %p1044_p13, %p1657_p10  ;;  %s1049_s11 = scalar_lea.vmem %s1048_s2, 4096 }
 0x193   : > { %s764_s0 = sshll.u32 %s1655_s21, 11  ;;  %p1050_p6 = scmp.lt.s32.totalorder %s1533_s18, %s1048_s2 }
 0x194   : > { %s1530_s7 = scalar_lea.hbm %s1656_s28, %s764_s0  ;;  %p1046_p3 = pneg %p1045_p9 }
 0x195   : > { %p1051_p11 = scmp.lt.s32.totalorder %s1049_s11, %s1043_s15 }
 0x197   : > { %p1052_p12 = por %p1051_p11, %p1050_p6 }
 0x199   : > { %p1053_p0 = pnand %p1052_p12, %p1046_p3 }
 0x19b   : > { %1056 = shalt.err (!%p1053_p0)
}
 0x19c   : > { %s1057_s10 = scalar_lea.hbm %s1530_s7, 2048  ;;  %s1061_s22 = scalar_lea.hbm %s1656_s28, 6144 }
 0x19d   : > { %p1058_p8 = scmp.ne.s32.totalorder %s1530_s7, %s1057_s10  ;;  %p1062_p5 = scmp.lt.u32.totalorder %s1530_s7, %s1656_s28 }
 0x19e   : > { %p1063_p4 = scmp.lt.u32.totalorder %s1061_s22, %s1057_s10  ;;  %p1065_p13 = scmp.lt.u32.totalorder %s1057_s10, %s1530_s7 }
 0x19f   : > { %p1059_p7 = pnand %p1058_p8, %p1657_p10 }
 0x1a0   : > { %p1064_p2 = por %p1063_p4, %p1062_p5 }
 0x1a1   : > { %p1060_p1 = pneg %p1059_p7 }
 0x1a2   : > { %p1066_p9 = por %p1065_p13, %p1064_p2 }
 0x1a4   : > { %p1067_p3 = pnand %p1066_p9, %p1060_p1 }
 0x1a6   : > { %1070 = shalt.err (!%p1067_p3)
}
 0x1a7   : > { %s1202_s0 = smov 128   ;;  %s1203_s24 = smov 8  }
 0x1a8   : > { %834 = dma.vmem_to_hbm [thread:$0]  (%p1657_p10), %s1533_s18, 2048, %s1530_s7, %s1537_s4, %s1202_s0, %s1202_s0, %s1203_s24  }
 0x1a9 PF: > { %p848_p6 = scmp.ge.s32.totalorder %s1193_s25, 2  ;;  %s630_s3 = sand.u32 1, %s1141_s12  }
 0x1aa   : > { %p1658_p11 = scmp.ne.s32.totalorder %s1647_s30, 0  ;;  %s631_s15 = scalar_lea.sflag [#allocation5], %s630_s3 }
 0x1ac   : > { %p844_p12 = pnand %p848_p6, %p1658_p11 }
 0x1ae   : > { %1136 = dma.done.wait (!%p844_p12), %s631_s15, 2048  }
 0x1af   : > { %1138 = vsyncadd (!%p844_p12), %s631_s15, 4294965248  ;;  %s22_s25 = sadd.s32 1, %s1193_s25   ;;  %s1660_s21 = sld [smem:[#allocation13_spill]] }
 0x1b0   : > { %p1566_p0 = scmp.ge.s32.totalorder %s22_s25, 11   ;;  %s1661_s22 = sld [smem:[#allocation14_spill]] }
 0x1b1   : > { %s1662_s23 = sld [smem:[#allocation15_spill]]  ;;  %s1663_s24 = sld [smem:[#allocation16_spill]] }
 0x1b2   : > { %s1664_s12 = smov %s1145_s13  ;;  %s1665_s13 = smov %s1149_s14 }
 0x1b3   : > { %s1666_s14 = smov %s1325_s8  ;;  %s1667_s15 = smov %s1157_s16 }
 0x1b4   : > { %s1668_s16 = smov %s1161_s17  ;;  %s1669_s17 = smov %s1391_s5 }
 0x1b5   : > { %s1670_s18 = smov %s1169_s19  ;;  %s1671_s19 = smov %s1173_s20 }
 0x1b6   : > { %s1672_s20 = smov %s1328_s9  ;;  %21 = sbr.rel (!%p1566_p0) target bundleno = 16 (0x10), region = 98 }
 0x1bd   :  { %636 = vsyncpa [#allocation4], 1 }
 0x1be   :  { %638 = vsyncpa [#allocation4 + $0x1], 1 }
 0x1bf   :  { %639 = vsyncpa [#allocation7], 1 }
 0x1c0   :  { %641 = vsyncpa [#allocation7 + $0x1], 1 }
 0x1c1   :  { %642 = vsyncpa [#allocation5], 1 }
 0x1c2   :  { %644 = vsyncpa [#allocation5 + $0x1], 1 }

</bundles_post_ra>
